<compile_context>
chip_gen: v7x
topology: tpu7x:2x2x1
jax: 0.10.0
libtpu: 0.0.40
codegen_flags: <defaults>
</compile_context>

<pallas_src>
import functools

import jax
import jax.numpy as jnp
from jax.experimental import pallas as pl
from jax.experimental.pallas import tpu as pltpu


def _round_up(x, m):
    return (x + m - 1) // m * m


def hgnnp_fused_kernel(x_ref, w_ref, b_ref, hn_ref, hnt_ref, o_ref):
    """One grid step == one HGNNPConv layer (+ ReLU). o_ref carries X across layers."""
    l = pl.program_id(0)

    @pl.when(l == 0)
    def _seed():
        o_ref[...] = x_ref[...]            # layer-0 input -> resident carry

    x = o_ref[...]                         # bf16 (Np, Cp) carry from previous layer
    w = w_ref[0]                           # bf16 (Cp, Cp) this layer's (zero-padded) weight
    b = b_ref[0]                           # f32  (1, Cp)
    # theta linear (bf16 operands, f32 accumulate)
    xt = jnp.dot(x, w, preferred_element_type=jnp.float32) + b
    # v2e mean aggregation (De^-1 pre-folded into HnT)
    e = jnp.dot(hnt_ref[...], xt.astype(jnp.bfloat16),
                preferred_element_type=jnp.float32)
    # e2v mean aggregation (Dv^-1 pre-folded into Hn) + ReLU
    y = jnp.dot(hn_ref[...], e.astype(jnp.bfloat16),
                preferred_element_type=jnp.float32)
    o_ref[...] = jnp.maximum(y, 0.0).astype(o_ref.dtype)   # carry + final output


def hgnnp_forward(x, h, params, dropout, training=False):
    """Fused multi-layer HGNNP forward. params: list of (W (Cin,Cout), b (1,Cout))."""
    n, c_in = x.shape
    m = h.shape[1]
    c_hid = params[0][0].shape[1]
    num_layers = len(params)
    # stacking assumes a uniform hidden width (first layer maps c_in -> c_hid)
    for i, (w, b) in enumerate(params):
        assert w.shape == ((c_in if i == 0 else c_hid), c_hid) and b.shape == (1, c_hid)

    f32, bf16 = jnp.float32, jnp.bfloat16

    # lane/sublane-friendly padded sizes (bf16 min tile is (16, 128))
    cp = _round_up(max(c_in, c_hid), 128)
    np_ = _round_up(n, 16)
    mp = _round_up(m, 128)

    # fold mean-aggregation degree scalings into the incidence operators (host-side)
    hf = h.astype(f32)
    de_inv = 1.0 / jnp.maximum(hf.sum(axis=0), 1.0)           # (M,)  edge degrees
    dv_inv = 1.0 / jnp.maximum(hf.sum(axis=1), 1.0)           # (N,)  vertex degrees
    hn = jnp.pad((dv_inv[:, None] * hf).astype(bf16), ((0, np_ - n), (0, mp - m)))
    hnt = jnp.pad((de_inv[:, None] * hf.T).astype(bf16), ((0, mp - m), (0, np_ - n)))
    x_pad = jnp.pad(x.astype(bf16), ((0, np_ - n), (0, cp - c_in)))

    # stack per-layer weights/biases into lane-dense padded slabs (padded lanes stay 0,
    # so padded channels remain exactly zero through bias/ReLU)
    w_stack = jnp.stack(
        [jnp.pad(w.astype(bf16), ((0, cp - w.shape[0]), (0, cp - w.shape[1])))
         for (w, _) in params])                               # (L, Cp, Cp) bf16
    b_stack = jnp.stack(
        [jnp.pad(b.astype(f32), ((0, 0), (0, cp - b.shape[1])))
         for (_, b) in params])                               # (L, 1, Cp) f32

    # explicit scoped-VMEM limit from the double-buffered window footprint (+2x headroom)
    footprint = 2 * (np_ * cp * 2            # X seed window (bf16)
                     + cp * cp * 2           # W_l window (bf16)
                     + cp * 4                # b_l window (f32)
                     + np_ * mp * 2          # Hn (bf16)
                     + mp * np_ * 2          # HnT (bf16)
                     + np_ * cp * 2)         # output / carry window (bf16)
    vmem_limit = int(min(max(2 * footprint, 32 * 1024 * 1024), 96 * 1024 * 1024))

    out_pad = pl.pallas_call(
        hgnnp_fused_kernel,
        out_shape=jax.ShapeDtypeStruct((np_, cp), bf16),
        grid_spec=pltpu.PrefetchScalarGridSpec(
            num_scalar_prefetch=0,
            grid=(num_layers,),
            in_specs=[
                pl.BlockSpec((np_, cp), lambda l: (0, 0)),       # X (read once at l==0)
                pl.BlockSpec((1, cp, cp), lambda l: (l, 0, 0)),  # W_l (prefetched per layer)
                pl.BlockSpec((1, 1, cp), lambda l: (l, 0, 0)),   # b_l
                pl.BlockSpec((np_, mp), lambda l: (0, 0)),       # Hn  (resident across layers)
                pl.BlockSpec((mp, np_), lambda l: (0, 0)),       # HnT (resident across layers)
            ],
            out_specs=pl.BlockSpec((np_, cp), lambda l: (0, 0)),  # resident carry + output
        ),
        compiler_params=pltpu.CompilerParams(
            dimension_semantics=("arbitrary",),   # layer axis is a sequential dependency
            vmem_limit_bytes=vmem_limit,
        ),
    )(x_pad, w_stack, b_stack, hn, hnt)

    # F.dropout(x, p=dropout, training=False) == identity in eval mode.
    # TODO(synk): training-mode dropout (pltpu.prng_*) not implemented; inference only.
    del dropout, training
    return out_pad[:n, :c_hid].astype(f32)


def init_hgnnp_params(key, input_channels, hidden_channels, num_layers):
    """Deterministic nn.Linear-style (uniform +/- 1/sqrt(fan_in)) init per layer."""
    layers = []
    dims = [input_channels] + [hidden_channels] * num_layers
    for i in range(num_layers):
        key, kw, kb = jax.random.split(key, 3)
        cin, cout = dims[i], dims[i + 1]
        bound = 1.0 / float(cin) ** 0.5
        w = jax.random.uniform(kw, (cin, cout), jnp.float32, -bound, bound)
        b = jax.random.uniform(kb, (1, cout), jnp.float32, -bound, bound)
        layers.append((w, b))
    return layers


def hgnnp_reference(x, h, params):
    """Pure-JAX f32 reference matching the PyTorch module's forward (eval mode)."""
    de_inv = 1.0 / jnp.maximum(h.sum(axis=0), 1.0)
    dv_inv = 1.0 / jnp.maximum(h.sum(axis=1), 1.0)
    for (w, b) in params:
        xt = x @ w + b
        e = de_inv[:, None] * (h.T @ xt)
        y = dv_inv[:, None] * (h @ e)
        x = jnp.maximum(y, 0.0)
    return x


def hgnnp_reference_bf16(x, h, params):
    """Same math with the kernel's bf16 operand / f32 accumulation cast points."""
    bf, f32 = jnp.bfloat16, jnp.float32
    de_inv = 1.0 / jnp.maximum(h.sum(axis=0), 1.0)
    dv_inv = 1.0 / jnp.maximum(h.sum(axis=1), 1.0)
    hn = (dv_inv[:, None] * h).astype(bf)
    hnt = (de_inv[:, None] * h.T).astype(bf)
    x = x.astype(bf)
    for (w, b) in params:
        xt = jnp.dot(x, w.astype(bf), preferred_element_type=f32) + b
        e = jnp.dot(hnt, xt.astype(bf), preferred_element_type=f32)
        y = jnp.dot(hn, e.astype(bf), preferred_element_type=f32)
        x = jnp.maximum(y, 0.0).astype(bf)
    return x.astype(f32)


if __name__ == "__main__":
    key = jax.random.PRNGKey(0)
    N, M = 16, 8                        # vertices, hyperedges
    input_channels, hidden_channels = 8, 32
    num_layers, dropout = 3, 0.5

    k1, k2, k3 = jax.random.split(key, 3)
    x = jax.random.normal(k1, (N, input_channels), dtype=jnp.float32)

    # deterministic binary incidence matrix; ensure no empty edges / isolated vertices
    h = (jax.random.uniform(k2, (N, M)) < 0.4).astype(jnp.float32)
    h = h.at[jnp.arange(M) % N, jnp.arange(M)].set(1.0)
    h = h.at[jnp.arange(N), jnp.arange(N) % M].set(1.0)

    params = init_hgnnp_params(k3, input_channels, hidden_channels, num_layers)

    fwd = jax.jit(functools.partial(hgnnp_forward, dropout=dropout, training=False))
    out = fwd(x, h, params)
    jax.block_until_ready(out)
    assert out.shape == (N, hidden_channels)

    # structural check: tight tolerance vs. a reference using the same bf16 cast points
    ref_bf16 = hgnnp_reference_bf16(x, h, params)
    assert jnp.allclose(out, ref_bf16, rtol=2e-3, atol=2e-3), \
        float(jnp.max(jnp.abs(out - ref_bf16)))
    # semantics check: bf16-appropriate tolerance vs. the f32 PyTorch-equivalent math
    ref_f32 = hgnnp_reference(x, h, params)
    assert jnp.allclose(out, ref_f32, rtol=3e-2, atol=3e-2), \
        float(jnp.max(jnp.abs(out - ref_f32)))
    print("KERNEL_OK")
</pallas_src>

<mosaic_0001>
module attributes {stable_mosaic.version = 11 : i64} {
  func.func @hgnnp_fused_kernel(%arg0: i32, %arg1: memref<16x128xbf16, #tpu.memory_space<vmem>>, %arg2: memref<1x128x128xbf16, #tpu.memory_space<vmem>>, %arg3: memref<1x1x128xf32, #tpu.memory_space<vmem>>, %arg4: memref<16x128xbf16, #tpu.memory_space<vmem>>, %arg5: memref<128x16xbf16, #tpu.memory_space<vmem>>, %arg6: memref<16x128xbf16, #tpu.memory_space<vmem>>) attributes {dimension_semantics = [#tpu.dimension_semantics<arbitrary>], iteration_bounds = array<i64: 3>, scalar_prefetch = 0 : i64, scratch_operands = 0 : i64, tpu.core_type = #tpu.core_type<tc>, window_params = [{pipeline_mode = #tpu.pipeline_mode<synchronous>, transform_indices = @transform_0, window_bounds = array<i64: 16, 128>}, {transform_indices = @transform_1, window_bounds = array<i64: 1, 128, 128>}, {transform_indices = @transform_2, window_bounds = array<i64: 1, 1, 128>}, {pipeline_mode = #tpu.pipeline_mode<synchronous>, transform_indices = @transform_3, window_bounds = array<i64: 16, 128>}, {pipeline_mode = #tpu.pipeline_mode<synchronous>, transform_indices = @transform_4, window_bounds = array<i64: 128, 16>}, {pipeline_mode = #tpu.pipeline_mode<synchronous>, transform_indices = @transform_5, window_bounds = array<i64: 16, 128>}]} {
    %c0_i32 = arith.constant 0 : i32
    %0 = arith.cmpi eq, %arg0, %c0_i32 : i32
    %1 = arith.extui %0 : i1 to i32
    %c0_i32_0 = arith.constant 0 : i32
    %2 = arith.cmpi ne, %1, %c0_i32_0 : i32
    scf.if %2 {
      %c0_17 = arith.constant 0 : index
      %c0_18 = arith.constant 0 : index
      %21 = vector.load %arg1[%c0_17, %c0_18] : memref<16x128xbf16, #tpu.memory_space<vmem>>, vector<16x128xbf16>
      %c0_19 = arith.constant 0 : index
      %c0_20 = arith.constant 0 : index
      %22 = vector.load %arg6[%c0_19, %c0_20] : memref<16x128xbf16, #tpu.memory_space<vmem>>, vector<16x128xbf16>
      tpu.vector_store %arg6[%c0_19, %c0_20], %21 {strides = array<i32>} : memref<16x128xbf16, #tpu.memory_space<vmem>>, vector<16x128xbf16>,
    } else {
    }
    %c0 = arith.constant 0 : index
    %c0_1 = arith.constant 0 : index
    %3 = vector.load %arg6[%c0, %c0_1] : memref<16x128xbf16, #tpu.memory_space<vmem>>, vector<16x128xbf16>
    %c0_2 = arith.constant 0 : index
    %c0_3 = arith.constant 0 : index
    %c0_4 = arith.constant 0 : index
    %4 = vector.load %arg2[%c0_2, %c0_3, %c0_4] : memref<1x128x128xbf16, #tpu.memory_space<vmem>>, vector<1x128x128xbf16>
    %5 = vector.shape_cast %4 : vector<1x128x128xbf16> to vector<128x128xbf16>
    %c0_5 = arith.constant 0 : index
    %c0_6 = arith.constant 0 : index
    %c0_7 = arith.constant 0 : index
    %6 = vector.load %arg3[%c0_5, %c0_6, %c0_7] : memref<1x1x128xf32, #tpu.memory_space<vmem>>, vector<1x1x128xf32>
    %7 = vector.shape_cast %6 : vector<1x1x128xf32> to vector<1x128xf32>
    %cst = arith.constant dense<0.000000e+00> : vector<16x128xf32>
    %8 = tpu.matmul %3, %5, %cst {dimension_numbers = #tpu.dot_dimension_numbers<[1], [0], [0], [1], [0, 0, 1, 1], [], []>} : vector<16x128xbf16>, vector<128x128xbf16>, vector<16x128xf32> -> vector<16x128xf32>
    %9 = vector.broadcast %7 : vector<1x128xf32> to vector<16x128xf32>
    %10 = arith.addf %8, %9 : vector<16x128xf32>
    %c0_8 = arith.constant 0 : index
    %c0_9 = arith.constant 0 : index
    %11 = vector.load %arg5[%c0_8, %c0_9] : memref<128x16xbf16, #tpu.memory_space<vmem>>, vector<128x16xbf16>
    %12 = arith.truncf %10 : vector<16x128xf32> to vector<16x128xbf16>
    %cst_10 = arith.constant dense<0.000000e+00> : vector<128x128xf32>
    %13 = tpu.matmul %11, %12, %cst_10 {dimension_numbers = #tpu.dot_dimension_numbers<[1], [0], [0], [1], [0, 0, 1, 1], [], []>} : vector<128x16xbf16>, vector<16x128xbf16>, vector<128x128xf32> -> vector<128x128xf32>
    %c0_11 = arith.constant 0 : index
    %c0_12 = arith.constant 0 : index
    %14 = vector.load %arg4[%c0_11, %c0_12] : memref<16x128xbf16, #tpu.memory_space<vmem>>, vector<16x128xbf16>
    %15 = arith.truncf %13 : vector<128x128xf32> to vector<128x128xbf16>
    %cst_13 = arith.constant dense<0.000000e+00> : vector<16x128xf32>
    %16 = tpu.matmul %14, %15, %cst_13 {dimension_numbers = #tpu.dot_dimension_numbers<[1], [0], [0], [1], [0, 0, 1, 1], [], []>} : vector<16x128xbf16>, vector<128x128xbf16>, vector<16x128xf32> -> vector<16x128xf32>
    %cst_14 = arith.constant 0.000000e+00 : f32
    %17 = vector.broadcast %cst_14 : f32 to vector<16x128xf32>
    %18 = arith.maximumf %16, %17 : vector<16x128xf32>
    %19 = arith.truncf %18 : vector<16x128xf32> to vector<16x128xbf16>
    %c0_15 = arith.constant 0 : index
    %c0_16 = arith.constant 0 : index
    %20 = vector.load %arg6[%c0_15, %c0_16] : memref<16x128xbf16, #tpu.memory_space<vmem>>, vector<16x128xbf16>
    tpu.vector_store %arg6[%c0_15, %c0_16], %19 {strides = array<i32>} : memref<16x128xbf16, #tpu.memory_space<vmem>>, vector<16x128xbf16>,
    return
  }
  func.func @transform_0(%arg0: i32) -> (i32, i32) {
    %c0_i32 = arith.constant 0 : i32
    %c0_i32_0 = arith.constant 0 : i32
    %c0_i32_1 = arith.constant 0 : i32
    return %c0_i32, %c0_i32_0 : i32, i32
  }
  func.func @transform_1(%arg0: i32) -> (i32, i32, i32) {
    %c0_i32 = arith.constant 0 : i32
    %c0_i32_0 = arith.constant 0 : i32
    %c0_i32_1 = arith.constant 0 : i32
    return %arg0, %c0_i32, %c0_i32_0 : i32, i32, i32
  }
  func.func @transform_2(%arg0: i32) -> (i32, i32, i32) {
    %c0_i32 = arith.constant 0 : i32
    %c0_i32_0 = arith.constant 0 : i32
    %c0_i32_1 = arith.constant 0 : i32
    return %arg0, %c0_i32, %c0_i32_0 : i32, i32, i32
  }
  func.func @transform_3(%arg0: i32) -> (i32, i32) {
    %c0_i32 = arith.constant 0 : i32
    %c0_i32_0 = arith.constant 0 : i32
    %c0_i32_1 = arith.constant 0 : i32
    return %c0_i32, %c0_i32_0 : i32, i32
  }
  func.func @transform_4(%arg0: i32) -> (i32, i32) {
    %c0_i32 = arith.constant 0 : i32
    %c0_i32_0 = arith.constant 0 : i32
    %c0_i32_1 = arith.constant 0 : i32
    return %c0_i32, %c0_i32_0 : i32, i32
  }
  func.func @transform_5(%arg0: i32) -> (i32, i32) {
    %c0_i32 = arith.constant 0 : i32
    %c0_i32_0 = arith.constant 0 : i32
    %c0_i32_1 = arith.constant 0 : i32
    return %c0_i32, %c0_i32_0 : i32, i32
  }
}

</mosaic_0001>

<bundles_post_ra>
// kernel: hgnnp_forward.1
= control target key start
LH: loop header
LB: loop body
LE: loop exit
PB: predicated region body
PF: predicated region fallthrough
CT: control target
= control target key end

     0   :  { %s837_s18 = smov 0   ;;  %s930_s0 = inlined_call_operand.vmem [shape: bf16[16,128], index: 0, kind: input, shape index: {}]   ;;  %s931_s1 = inlined_call_operand.vmem [shape: bf16[3,128,128], index: 1, kind: input, shape index: {}]   ;;  %s932_s2 = inlined_call_operand.vmem [shape: f32[3,1,128], index: 2, kind: input, shape index: {}]   ;;  %s933_s3 = inlined_call_operand.vmem [shape: bf16[16,128], index: 3, kind: input, shape index: {}]   ;;  %s934_s4 = inlined_call_operand.vmem [shape: bf16[128,16], index: 4, kind: input, shape index: {}]   ;;  %s935_s5 = inlined_call_operand.vmem [shape: bf16[16,128], index: 5, kind: output, shape index: {}]  }
   0x1 LB: > { %s638_s19 = sadd.s32 4294967295, %s803_s18   ;;  %p641_p0 = scmp.ge.s32.totalorder %s803_s18, 1  ;;  %s803_s18 = sphi %s837_s18, %s15_s18  }
   0x2   : > { %p190_p1 = scmp.lt.s32.totalorder %s803_s18, 4 }
   0x4   : > { %p191_p2 = pnand %p641_p0, %p190_p1 }
   0x5   : > { %p216_p3 = scmp.lt.s32.totalorder (!%p191_p2), %s638_s19, 2  ;;  %p644_p4 = scmp.ne.s32.totalorder (!%p191_p2), %s638_s19, 0 }
   0x6   : > { %194 = sbr.rel (%p191_p2) target bundleno = 743 (0x2e7), region = 40 }
   0xd   : > { %s845_s20 = scalar_select %p216_p3, %s638_s19, 2 }
   0xe   : > { %228 = sbr.rel (%p644_p4) target bundleno = 21 (0x15), region = 44  ;;  %v229_v0 = vld [vmem:[%s930_s0] sm:$0xff] (!%p644_p4)  }
   0xf   : > { %s676_s21 = sshll.u32 %s845_s20, 6  ;;  %s223_s24 = scalar_lea.vmem %s932_s2, %s845_s20  ;;  %231 = vst [vmem:[%s935_s5] sm:$0xff] (!%p644_p4), %v229_v0  }
  0x10   : > { %s220_s27 = scalar_lea.vmem %s931_s1, %s676_s21 }
  0x15 PF: > { %v779_v1 = vld [vmem:[%s220_s27] sm:$0xff]   ;;  %v805_v2 = vmov 0.0   ;;  %v780_v3 = vld [vmem:[%s220_s27 + $0x8] sm:$0xff]   ;;  %vm806_vm0 = vmmov 0   ;;  %v781_v4 = vld [vmem:[%s220_s27 + $0x10] sm:$0xff]   ;;  %vm410_vm1 = vcmask 130048  }
  0x16   : > { %711 = vmatprep.subr.bf16.mxu0 %v805_v2  ;;  %727 = vmatprep.mubr.msk.bf16.mxu0 %vm806_vm0, %v805_v2  ;;  %v782_v5 = vld [vmem:[%s220_s27 + $0x18] sm:$0xff]   ;;  %v783_v6 = vld [vmem:[%s220_s27 + $0x20] sm:$0xff]   ;;  %v784_v7 = vld [vmem:[%s220_s27 + $0x28] sm:$0xff]  }
  0x17   : > { %712 = vmatpush3.bf16.msra.mxu0 %v779_v1  ;;  %v785_v8 = vld [vmem:[%s220_s27 + $0x30] sm:$0xff]   ;;  %v786_v9 = vld [vmem:[%s220_s27 + $0x38] sm:$0xff]   ;;  %v787_v10 = vld [vmem:[%s935_s5] sm:$0xff]  }
  0x18   : > { %713 = vmatprep.subr.bf16.mxu0 %v805_v2  ;;  %v788_v11 = vld [vmem:[%s934_s4] sm:$0xff]   ;;  %v789_v20 = vld [vmem:[%s934_s4 + $0x8] sm:$0xff]   ;;  %v790_v21 = vld [vmem:[%s934_s4 + $0x10] sm:$0xff]  }
  0x19   : > { %733 = vmatprep.mubr.msk.bf16.mxu1 %vm410_vm1, %v788_v11  ;;  %v645_v12 = vld [vmem:[%s223_s24] ss:$0 sm:$0xff]  ;;  %v791_v22 = vld [vmem:[%s934_s4 + $0x18] sm:$0xff]   ;;  %v793_v24 = vld [vmem:[%s934_s4 + $0x28] sm:$0xff]  }
  0x1a   : > { %v792_v23 = vld [vmem:[%s934_s4 + $0x20] sm:$0xff]   ;;  %v794_v25 = vld [vmem:[%s934_s4 + $0x30] sm:$0xff]   ;;  %v795_v26 = vld [vmem:[%s934_s4 + $0x38] sm:$0xff]  }
  0x1b   : > { %714 = vmatpush3.bf16.msra.mxu0 %v780_v3  ;;  %v796_v51 = vld [vmem:[%s933_s3] sm:$0xff]  }
  0x1c   : > { %715 = vmatprep.subr.bf16.mxu0 %v805_v2 }
  0x1f   : > { %716 = vmatpush3.bf16.msra.mxu0 %v781_v4 }
  0x20   : > { %717 = vmatprep.subr.bf16.mxu0 %v805_v2 }
  0x23   : > { %718 = vmatpush3.bf16.msra.mxu0 %v782_v5 }
  0x24   : > { %719 = vmatprep.subr.bf16.mxu0 %v805_v2 }
  0x27   : > { %720 = vmatpush3.bf16.msra.mxu0 %v783_v6 }
  0x28   : > { %721 = vmatprep.subr.bf16.mxu0 %v805_v2 }
  0x2b   : > { %722 = vmatpush3.bf16.msra.mxu0 %v784_v7 }
  0x2c   : > { %723 = vmatprep.subr.bf16.mxu0 %v805_v2 }
  0x2f   : > { %724 = vmatpush3.bf16.msra.mxu0 %v785_v8 }
  0x30   : > { %725 = vmatprep.subr.bf16.mxu0 %v805_v2 }
  0x33   : > { %726 = vmatpush3.bf16.msra.mxu0 %v786_v9 }
  0x36   : > { %728 = vmatmul.mubr.bf16.vlgmr.msra.gmra.mrb[0].mxu0 %v787_v10 }
 0x109   : > { %v346_v13 = vpop.f32.mrb[0].mxu0 }
 0x10a   : > { %v729_v14 = vpop.f32.mrb[1].mxu0  ;;  %v347_v16 = vadd.f32 %v645_v12, %v346_v13 }
 0x10b   : > { %v349_v15 = vpop.f32.mrb[2].mxu0 }
 0x10c   : > { %v350_v17 = vadd.f32 %v645_v12, %v349_v15  ;;  %v730_v18 = vpop.f32.mrb[3].mxu0 }
 0x10e   : > { %v369_v19 = vpack.c.bf16 %v350_v17, %v347_v16 }
 0x110   : > { %731 = vmatprep.subr.bf16.mxu1 %v369_v19 }
 0x111   : > { %732 = vmatpush3.bf16.msra.mxu1 %v369_v19 }
 0x112   : > { %749 = vmatprep.subr.bf16.mxu1 %v805_v2 }
 0x114   : > { %734 = vmatmul.mubr.msk.bf16.vlgmr.msra.gmra.mrb[0].mxu1 %vm410_vm1, %v789_v20 }
 0x115   : > { %737 = vmatprep.mubr.msk.bf16.mxu1 %vm410_vm1, %v790_v21 }
 0x11c   : > { %738 = vmatmul.mubr.msk.bf16.gmra.mrb[4].mxu1 %vm410_vm1, %v791_v22 }
 0x11d   : > { %741 = vmatprep.mubr.msk.bf16.mxu1 %vm410_vm1, %v792_v23 }
 0x124   : > { %742 = vmatmul.mubr.msk.bf16.gmra.mrb[8].mxu1 %vm410_vm1, %v793_v24 }
 0x125   : > { %745 = vmatprep.mubr.msk.bf16.mxu1 %vm410_vm1, %v794_v25 }
 0x12c   : > { %746 = vmatmul.mubr.msk.bf16.gmra.mrb[12].mxu1 %vm410_vm1, %v795_v26 }
 0x12d   : > { %765 = vmatprep.mubr.msk.bf16.mxu1 %vm806_vm0, %v805_v2 }
 0x1e7   : > { %v735_v27 = vpop.f32.mrb[0].mxu1 }
 0x1e8   : > { %v469_v28 = vpop.f32.mrb[1].mxu1 }
 0x1e9   : > { %v736_v29 = vpop.f32.mrb[2].mxu1 }
 0x1ea   : > { %v535_v30 = vpack.c.bf16 %v736_v29, %v735_v27  ;;  %v472_v31 = vpop.f32.mrb[3].mxu1 }
 0x1eb   : > { %v534_v32 = vpack.c.bf16 %v472_v31, %v469_v28 }
 0x1ed   : > { %750 = vmatpush3.bf16.msra.mxu1 %v534_v32 }
 0x1ee   : > { %751 = vmatprep.subr.bf16.mxu1 %v805_v2 }
 0x1ef   : > { %v739_v33 = vpop.f32.mrb[4].mxu1 }
 0x1f0   : > { %v485_v34 = vpop.f32.mrb[5].mxu1 }
 0x1f1   : > { %v740_v35 = vpop.f32.mrb[6].mxu1  ;;  %752 = vmatpush3.bf16.msra.mxu1 %v535_v30 }
 0x1f2   : > { %v537_v36 = vpack.c.bf16 %v740_v35, %v739_v33  ;;  %v488_v37 = vpop.f32.mrb[7].mxu1  ;;  %753 = vmatprep.subr.bf16.mxu1 %v805_v2 }
 0x1f3   : > { %v536_v38 = vpack.c.bf16 %v488_v37, %v485_v34 }
 0x1f5   : > { %754 = vmatpush3.bf16.msra.mxu1 %v536_v38 }
 0x1f6   : > { %755 = vmatprep.subr.bf16.mxu1 %v805_v2 }
 0x1f7   : > { %v743_v39 = vpop.f32.mrb[8].mxu1 }
 0x1f8   : > { %v501_v40 = vpop.f32.mrb[9].mxu1 }
 0x1f9   : > { %v744_v41 = vpop.f32.mrb[10].mxu1  ;;  %756 = vmatpush3.bf16.msra.mxu1 %v537_v36 }
 0x1fa   : > { %v539_v42 = vpack.c.bf16 %v744_v41, %v743_v39  ;;  %v504_v43 = vpop.f32.mrb[11].mxu1  ;;  %757 = vmatprep.subr.bf16.mxu1 %v805_v2 }
 0x1fb   : > { %v538_v44 = vpack.c.bf16 %v504_v43, %v501_v40 }
 0x1fd   : > { %758 = vmatpush3.bf16.msra.mxu1 %v538_v44 }
 0x1fe   : > { %759 = vmatprep.subr.bf16.mxu1 %v805_v2 }
 0x1ff   : > { %v747_v45 = vpop.f32.mrb[12].mxu1 }
 0x200   : > { %v517_v46 = vpop.f32.mrb[13].mxu1 }
 0x201   : > { %v748_v47 = vpop.f32.mrb[14].mxu1  ;;  %760 = vmatpush3.bf16.msra.mxu1 %v539_v42 }
 0x202   : > { %v541_v48 = vpack.c.bf16 %v748_v47, %v747_v45  ;;  %v520_v49 = vpop.f32.mrb[15].mxu1  ;;  %761 = vmatprep.subr.bf16.mxu1 %v805_v2 }
 0x203   : > { %v540_v50 = vpack.c.bf16 %v520_v49, %v517_v46 }
 0x205   : > { %762 = vmatpush3.bf16.msra.mxu1 %v540_v50 }
 0x206   : > { %763 = vmatprep.subr.bf16.mxu1 %v805_v2 }
 0x209   : > { %764 = vmatpush3.bf16.msra.mxu1 %v541_v48 }
 0x20c   : > { %766 = vmatmul.mubr.bf16.vlgmr.msra.gmra.mrb[16].mxu1 %v796_v51 }
 0x2df   : > { %v582_v52 = vpop.f32.mrb[16].mxu1 }
 0x2e0   : > { %v767_v53 = vpop.f32.mrb[17].mxu1  ;;  %v589_v55 = vmax.f32 %v582_v52, 0.0 }
 0x2e1   : > { %v585_v54 = vpop.f32.mrb[18].mxu1 }
 0x2e2   : > { %v590_v56 = vmax.f32 %v585_v54, 0.0  ;;  %v768_v57 = vpop.f32.mrb[19].mxu1 }
 0x2e4   : > { %v682_v58 = vpack.c.bf16 %v590_v56, %v589_v55 }
 0x2e6   : > { %683 = vst [vmem:[%s935_s5] sm:$0xff] %v682_v58  }
 0x2e7 PF: > { %s15_s18 = sadd.s32 1, %s803_s18  }
 0x2e8   : > { %p12_p5 = scmp.ge.s32.totalorder %s15_s18, 5  }
 0x2ea   :  { %14 = sbr.rel (!%p12_p5) target bundleno = 1 (0x1), region = 73 }

</bundles_post_ra>
